<compile_context>
chip_gen: v7x
topology: tpu7x:2x2x1
jax: 0.10.0
libtpu: 0.0.40
codegen_flags: <defaults>
</compile_context>

<pallas_src>
import jax
import jax.numpy as jnp
from jax import lax
from jax.experimental import pallas as pl
from jax.experimental.pallas import tpu as pltpu


def _se_kernel(x_ref, w1_ref, w2_ref, o_ref):
    # x_ref: (Bt, C, HW)   w1_ref: (Cr, C)   w2_ref: (C, Cr)   o_ref: (Bt, C, HW)
    x = x_ref[...]                                               # input dtype

    # --- squeeze: global average pool over spatial dims (f32 accumulation) ---
    pooled = jnp.mean(x.astype(jnp.float32), axis=-1)            # (Bt, C)

    # --- excitation: fc1 -> relu -> fc2 -> sigmoid (weights in (out,in)) ---
    # h = pooled @ w1.T  -> (Bt, Cr); contract C (axis 1) with w1 axis 1.
    h = lax.dot_general(pooled, w1_ref[...],
                        (((1,), (1,)), ((), ())),
                        preferred_element_type=jnp.float32)
    h = jnp.maximum(h, 0.0)
    # s = h @ w2.T -> (Bt, C)
    s = lax.dot_general(h, w2_ref[...],
                        (((1,), (1,)), ((), ())),
                        preferred_element_type=jnp.float32)
    s = jax.nn.sigmoid(s)

    # --- scale: broadcast per-(batch, channel) gate over spatial dims ---
    # Multiply/store in the input dtype (keeps bf16 paths bf16).
    gate = s.astype(x.dtype)[:, :, None]                         # (Bt, C, 1)
    o_ref[...] = x * gate


def _pick_batch_tile(b, per_batch_bytes, target_bytes):
    """Largest divisor of b giving ~target-sized blocks and >=2 grid steps."""
    bt = max(1, min(b, target_bytes // max(per_batch_bytes, 1)))
    if b >= 2:
        bt = min(bt, b // 2)        # keep >=2 steps: pipeline overlap + megacore
    bt = max(1, bt)
    while b % bt:                   # avoid partial edge blocks
        bt -= 1
    return bt


def se_module(x, w1, w2, *, target_block_bytes=4 << 20):
    """x: (B, C, H, W); w1: (Cr, C), w2: (C, Cr) in PyTorch Linear (out, in) layout."""
    b, c, h, w = x.shape
    cr = w1.shape[0]
    hw = h * w

    x_flat = x.reshape(b, c, hw)
    per_batch_bytes = c * hw * x.dtype.itemsize
    bt = _pick_batch_tile(b, per_batch_bytes, target_block_bytes)

    out_flat = pl.pallas_call(
        _se_kernel,
        out_shape=jax.ShapeDtypeStruct((b, c, hw), x.dtype),
        grid_spec=pltpu.PrefetchScalarGridSpec(
            num_scalar_prefetch=0,
            grid=(b // bt,),
            in_specs=[
                pl.BlockSpec((bt, c, hw), lambda i: (i, 0, 0)),
                pl.BlockSpec((cr, c), lambda i: (0, 0)),
                pl.BlockSpec((c, cr), lambda i: (0, 0)),
            ],
            out_specs=pl.BlockSpec((bt, c, hw), lambda i: (i, 0, 0)),
        ),
        compiler_params=pltpu.CompilerParams(
            dimension_semantics=("parallel",),
            vmem_limit_bytes=48 * 1024 * 1024,
        ),
    )(x_flat, w1, w2)

    return out_flat.reshape(b, c, h, w)


def _reference(x, w1, w2):
    pooled = jnp.mean(x, axis=(2, 3))                 # (B, C)
    h = jnp.maximum(pooled @ w1.T, 0.0)               # (B, Cr)
    s = jax.nn.sigmoid(h @ w2.T)                      # (B, C)
    return x * s[:, :, None, None]


if __name__ == "__main__":
    B, C, H, W = 2, 64, 16, 16
    reduction = 16
    Cr = C // reduction

    key = jax.random.PRNGKey(0)
    kx, k1, k2 = jax.random.split(key, 3)

    x = jax.random.normal(kx, (B, C, H, W), dtype=jnp.float32)
    # Deterministic synthetic weights (PyTorch Linear layout: (out, in)).
    w1 = jax.random.normal(k1, (Cr, C), dtype=jnp.float32) * (1.0 / (C ** 0.5))
    w2 = jax.random.normal(k2, (C, Cr), dtype=jnp.float32) * (1.0 / (Cr ** 0.5))

    out = jax.block_until_ready(se_module(x, w1, w2))

    ref = _reference(x, w1, w2)
    assert out.shape == (B, C, H, W)
    assert jnp.allclose(out, ref, atol=1e-5, rtol=1e-5), "mismatch vs reference"

    print("KERNEL_OK")
</pallas_src>

<mosaic_0001>
module attributes {stable_mosaic.version = 11 : i64} {
  func.func @_se_kernel(%arg0: i32, %arg1: memref<1x64x256xf32, #tpu.memory_space<vmem>>, %arg2: memref<4x64xf32, #tpu.memory_space<vmem>>, %arg3: memref<64x4xf32, #tpu.memory_space<vmem>>, %arg4: memref<1x64x256xf32, #tpu.memory_space<vmem>>) attributes {dimension_semantics = [#tpu.dimension_semantics<parallel>], iteration_bounds = array<i64: 2>, scalar_prefetch = 0 : i64, scratch_operands = 0 : i64, tpu.core_type = #tpu.core_type<tc>, window_params = [{transform_indices = @transform_0, window_bounds = array<i64: 1, 64, 256>}, {pipeline_mode = #tpu.pipeline_mode<synchronous>, transform_indices = @transform_1, window_bounds = array<i64: 4, 64>}, {pipeline_mode = #tpu.pipeline_mode<synchronous>, transform_indices = @transform_2, window_bounds = array<i64: 64, 4>}, {transform_indices = @transform_3, window_bounds = array<i64: 1, 64, 256>}]} {
    %c0 = arith.constant 0 : index
    %c0_0 = arith.constant 0 : index
    %c0_1 = arith.constant 0 : index
    %0 = vector.load %arg1[%c0, %c0_0, %c0_1] : memref<1x64x256xf32, #tpu.memory_space<vmem>>, vector<1x64x256xf32>
    %cst = arith.constant dense<0.000000e+00> : vector<1x64xf32>
    %1 = vector.multi_reduction <add>, %0, %cst [2] : vector<1x64x256xf32> to vector<1x64xf32>
    %cst_2 = arith.constant 2.560000e+02 : f32
    %2 = vector.broadcast %cst_2 : f32 to vector<1x64xf32>
    %3 = arith.divf %1, %2 : vector<1x64xf32>
    %c0_3 = arith.constant 0 : index
    %c0_4 = arith.constant 0 : index
    %4 = vector.load %arg2[%c0_3, %c0_4] : memref<4x64xf32, #tpu.memory_space<vmem>>, vector<4x64xf32>
    %cst_5 = arith.constant dense<0.000000e+00> : vector<1x4xf32>
    %5 = tpu.matmul %3, %4, %cst_5 {dimension_numbers = #tpu.dot_dimension_numbers<[1], [1], [0], [0], [0, 0, 1, 0], [], []>} : vector<1x64xf32>, vector<4x64xf32>, vector<1x4xf32> -> vector<1x4xf32>
    %cst_6 = arith.constant 0.000000e+00 : f32
    %6 = vector.broadcast %cst_6 : f32 to vector<1x4xf32>
    %7 = arith.maximumf %5, %6 : vector<1x4xf32>
    %c0_7 = arith.constant 0 : index
    %c0_8 = arith.constant 0 : index
    %8 = vector.load %arg3[%c0_7, %c0_8] : memref<64x4xf32, #tpu.memory_space<vmem>>, vector<64x4xf32>
    %cst_9 = arith.constant dense<0.000000e+00> : vector<1x64xf32>
    %9 = tpu.matmul %7, %8, %cst_9 {dimension_numbers = #tpu.dot_dimension_numbers<[1], [1], [0], [0], [0, 0, 1, 0], [], []>} : vector<1x4xf32>, vector<64x4xf32>, vector<1x64xf32> -> vector<1x64xf32>
    %10 = arith.negf %9 : vector<1x64xf32>
    %11 = math.exp %10 : vector<1x64xf32>
    %cst_10 = arith.constant 1.000000e+00 : f32
    %12 = vector.broadcast %cst_10 : f32 to vector<1x64xf32>
    %13 = arith.addf %12, %11 : vector<1x64xf32>
    %14 = arith.divf %12, %13 : vector<1x64xf32>
    %15 = vector.shape_cast %14 : vector<1x64xf32> to vector<1x64x1xf32>
    %16 = vector.broadcast %15 : vector<1x64x1xf32> to vector<1x64x256xf32>
    %17 = arith.mulf %0, %16 : vector<1x64x256xf32>
    %c0_11 = arith.constant 0 : index
    %c0_12 = arith.constant 0 : index
    %c0_13 = arith.constant 0 : index
    %18 = vector.load %arg4[%c0_11, %c0_12, %c0_13] : memref<1x64x256xf32, #tpu.memory_space<vmem>>, vector<1x64x256xf32>
    tpu.vector_store %arg4[%c0_11, %c0_12, %c0_13], %17 {strides = array<i32>} : memref<1x64x256xf32, #tpu.memory_space<vmem>>, vector<1x64x256xf32>,
    return
  }
  func.func @transform_0(%arg0: i32) -> (i32, i32, i32) {
    %c0_i32 = arith.constant 0 : i32
    %c0_i32_0 = arith.constant 0 : i32
    %c0_i32_1 = arith.constant 0 : i32
    return %arg0, %c0_i32, %c0_i32_0 : i32, i32, i32
  }
  func.func @transform_1(%arg0: i32) -> (i32, i32) {
    %c0_i32 = arith.constant 0 : i32
    %c0_i32_0 = arith.constant 0 : i32
    %c0_i32_1 = arith.constant 0 : i32
    return %c0_i32, %c0_i32_0 : i32, i32
  }
  func.func @transform_2(%arg0: i32) -> (i32, i32) {
    %c0_i32 = arith.constant 0 : i32
    %c0_i32_0 = arith.constant 0 : i32
    %c0_i32_1 = arith.constant 0 : i32
    return %c0_i32, %c0_i32_0 : i32, i32
  }
  func.func @transform_3(%arg0: i32) -> (i32, i32, i32) {
    %c0_i32 = arith.constant 0 : i32
    %c0_i32_0 = arith.constant 0 : i32
    %c0_i32_1 = arith.constant 0 : i32
    return %arg0, %c0_i32, %c0_i32_0 : i32, i32, i32
  }
}

</mosaic_0001>

<bundles_post_ra>
// kernel: tpu_custom_call.1
= control target key start
LH: loop header
LB: loop body
LE: loop exit
PB: predicated region body
PF: predicated region fallthrough
CT: control target
= control target key end

     0   :  { %8 = vsyncpa [#allocation3], 0  ;;  %s1213_s0 = inlined_call_operand.hbm [shape: f32[2,64,256], index: 0, kind: input, shape index: {}]   ;;  %s1214_s1 = inlined_call_operand.vmem [shape: f32[4,64], index: 1, kind: input, shape index: {}]   ;;  %s1215_s2 = inlined_call_operand.vmem [shape: f32[64,4], index: 2, kind: input, shape index: {}]   ;;  %s1216_s3 = inlined_call_operand.hbm [shape: f32[2,64,256], index: 3, kind: output, shape index: {}]  }
   0x1   :  { %10 = vsyncpa [#allocation3 + $0x1], 0 }
   0x2   :  { %11 = vsyncpa [#allocation4], 0 }
   0x3   :  { %13 = vsyncpa [#allocation4 + $0x1], 0  ;;  %s908_s12 = smov 0   ;;  %s910_s13 = smov 0  }
   0x4   :  { %s912_s14 = smov 0   ;;  %s914_s15 = smov 0  }
   0x5 LB: > { %s929_s16 = sadd.s32 4294967295, %s877_s15   ;;  %s645_s17 = sadd.s32 4294967294, %s877_s15   ;;  %s877_s15 = sphi %s914_s15, %s1231_s15   ;;  %s873_s14 = sphi %s912_s14, %s1230_s14   ;;  %s869_s13 = sphi %s910_s13, %s1229_s13   ;;  %s865_s12 = sphi %s908_s12, %s1228_s12  }
   0x6   : > { %s933_s18 = sadd.s32 1, %s877_s15   ;;  %s26_s19 = sadd.s32 1, %s873_s14 }
   0x7   : > { %s23_s20 = ssub.s32 %s877_s15, %s933_s18  ;;  %p33_p0 = scmp.ne.s32.totalorder %s873_s14, %s869_s13 }
   0x8   : > { %p24_p1 = scmp.eq.s32.totalorder %s23_s20, 0  ;;  %p34_p2 = scmp.eq.s32.totalorder %s877_s15, 0 }
   0x9   : > { %p39_p3 = scmp.ne.s32.totalorder %s869_s13, %s865_s12  ;;  %p40_p4 = scmp.eq.s32.totalorder %s929_s16, 0 }
   0xa   : > { %s945_s21 = scalar_select %p24_p1, %s873_s14, %s26_s19  }
   0xb   : > { %p947_p5 = por %p34_p2, %p33_p0  ;;  %p951_p6 = por %p40_p4, %p39_p3 }
   0xc   : > { %p105_p7 = scmp.eq.s32.totalorder %s929_s16, 1  ;;  %p111_p8 = scmp.eq.s32.totalorder %s645_s17, 1 }
   0xd   : > { %p736_p10 = scmp.lt.s32.totalorder %s877_s15, 2  ;;  %s137_s26 = sand.u32 1, %s873_s14  }
   0xe   : > { %p958_p11 = por %p105_p7, %p33_p0  ;;  %p962_p12 = por %p111_p8, %p39_p3 }
   0xf   : > { %s671_s27 = sshll.u32 %s877_s15, 11  ;;  %s648_s28 = sshll.u32 %s137_s26, 7 }
  0x10   : > { %s1220_s24 = scalar_select %p958_p11, 1, 0 }
  0x11   : > { %s1221_s25 = scalar_select %p962_p12, 1, 0 }
  0x12   : > { %s971_s4 = scalar_lea.hbm %s1213_s0, %s671_s27  ;;  %s141_s5 = scalar_lea.vmem [#allocation2], %s648_s28 }
  0x13   : > { %s148_s6 = sshll.u32 %s141_s5, 4  ;;  %p975_p13 = pnand %p736_p10, %p947_p5  ;;  %s979_s6 = int_to_ptr.vmem [resolvable:$true] %s148_s6 }
  0x14   : > { %s981_s8 = scalar_lea.sflag [#allocation3], %s137_s26  ;;  %s781_s9 = scalar_lea.hbm %s971_s4, 2048 }
  0x15   : > { %p782_p0 = scmp.ne.s32.totalorder %s971_s4, %s781_s9  ;;  %p783_p1 = pneg %p975_p13 }
  0x16   : > { %s786_s17 = scalar_lea.hbm %s1213_s0, 4096  ;;  %p787_p4 = scmp.lt.u32.totalorder %s971_s4, %s1213_s0 }
  0x17   : > { %p784_p2 = pnand %p783_p1, %p782_p0  ;;  %p788_p5 = scmp.lt.u32.totalorder %s786_s17, %s781_s9 }
  0x18   : > { %p790_p8 = scmp.lt.u32.totalorder %s781_s9, %s971_s4 }
  0x19   : > { %p785_p3 = pneg %p784_p2  ;;  %p789_p7 = por %p788_p5, %p787_p4 }
  0x1b   : > { %p791_p10 = por %p790_p8, %p789_p7 }
  0x1d   : > { %p792_p9 = pnand %p791_p10, %p785_p3 }
  0x1f   : > { %795 = shalt.err (!%p792_p9)
}
  0x20   : > { %s796_s22 = scalar_lea.vmem %s979_s6, 2048  ;;  %s879_s26 = smov [#allocation2]  }
  0x21   : > { %p797_p0 = scmp.ne.s32.totalorder %s979_s6, %s796_s22  ;;  %s801_s27 = sshll.u32 %s879_s26, 4  ;;  %s802_s27 = int_to_ptr.vmem [resolvable:$false] %s801_s27 }
  0x22   : > { %s803_s28 = scalar_lea.vmem %s802_s27, 4096  ;;  %p804_p11 = scmp.lt.s32.totalorder %s979_s6, %s802_s27 }
  0x23   : > { %p799_p2 = pnand %p797_p0, %p783_p1  ;;  %p805_p4 = scmp.lt.s32.totalorder %s803_s28, %s796_s22 }
  0x25   : > { %p800_p12 = pneg %p799_p2  ;;  %p806_p5 = por %p805_p4, %p804_p11 }
  0x27   : > { %p807_p7 = pnand %p806_p5, %p800_p12 }
  0x29   : > { %810 = shalt.err (!%p807_p7)
}
  0x2a   : > { %s880_s29 = smov 256   ;;  %s881_s30 = smov 16  }
  0x2b   : > { %731 = dma.hbm_to_vmem [thread:$0]  (!%p975_p13), %s971_s4, 2048, %s979_s6, %s981_s8, %s880_s29, %s880_s29, %s881_s30  }
  0x2c   : > { %p651_p9 = scmp.ge.s32.totalorder %s877_s15, 1  ;;  %p156_p1 = scmp.lt.s32.totalorder %s877_s15, 3 }
  0x2e   : > { %p157_p3 = pnand %p651_p9, %p156_p1 }
  0x2f   : > { %s1012_s5 = sand.u32 (!%p157_p3), 1, %s869_s13  }
  0x30   : > { %160 = sbr.rel (%p157_p3) target bundleno = 821 (0x335), region = 32  ;;  %s652_s9 = sshll.u32 (!%p157_p3), %s1012_s5, 7 }
  0x31   : > { %s163_s10 = scalar_lea.sflag (!%p157_p3), [#allocation3], %s1012_s5  ;;  %s166_s11 = scalar_lea.vmem (!%p157_p3), [#allocation2], %s652_s9 }
  0x37   : > { %856 = dma.done.wait (%p951_p6), %s163_s10, 2048  }
  0x38   : > { %858 = vsyncadd (%p951_p6), %s163_s10, 4294965248  ;;  %v1022_v0 = vld [vmem:[%s166_s11] sm:$0xff]  ;;  %v1024_v1 = vld [vmem:[%s166_s11 + $0x8] sm:$0xff]  ;;  %v882_v24 = vmov 0.0   ;;  %vm302_vm0 = vcmask 523264   ;;  %vm883_vm1 = vmmov 0   ;;  %v247_v40 = vlaneseq }
  0x39   : > { %v1026_v2 = vld [vmem:[%s166_s11 + $0x20] sm:$0xff]  ;;  %v205_v3 = vadd.f32 %v1024_v1, %v1022_v0  ;;  %v1030_v4 = vld [vmem:[%s166_s11 + $0x28] sm:$0xff]  ;;  %v1032_v5 = vld [vmem:[%s166_s11 + $0x10] sm:$0xff]  ;;  %684 = vmatprep.subr.mxu0 %v882_v24  ;;  %686 = vmatprep.mubr.msk.f32.mxu0 %vm883_vm1, %v882_v24  ;;  %vm387_vm2 = vcmask 31744   ;;  %v884_v28 = vmov 0.0|0.0   ;;  %vm258_vm4 = vcmask 130112  }
  0x3a   : > { %v1034_v6 = vld [vmem:[%s166_s11 + $0x18] sm:$0xff]  ;;  %v211_v7 = vadd.f32 %v1030_v4, %v1026_v2  ;;  %v1038_v8 = vld [vmem:[%s166_s11 + $0x30] sm:$0xff]  ;;  %v1046_v12 = vld [vmem:[%s166_s11 + $0x40] sm:$0xff]  ;;  %705 = vmatprep.mubr.msk.f32.mxu1 %vm883_vm1, %v882_v24  ;;  %708 = vmatprep.subr.bf16.mxu1 %v884_v28  ;;  %v248_v41 = vand.u32 127, %v247_v40  ;;  %v1112_v42 = vshrl.u32 %v247_v40, 7  ;;  %vm265_vm5 = vcmask 195712  }
  0x3b   : > { %v1040_v9 = vld [vmem:[%s166_s11 + $0x38] sm:$0xff]  ;;  %206 = vadd.xlane.f32.xlu0 %v205_v3  ;;  %v208_v10 = vadd.f32 %v1034_v6, %v1032_v5  ;;  %v1048_v13 = vld [vmem:[%s166_s11 + $0x48] sm:$0xff]  ;;  %v1050_v14 = vld [vmem:[%s166_s11 + $0x50] sm:$0xff]  ;;  %vm272_vm6 = vcmask 261312   ;;  %vm279_vm7 = vcmask 326912   ;;  %vm286_vm8 = vcmask 392512  }
  0x3c   : > { %212 = vadd.xlane.f32.xlu1 %v211_v7  ;;  %v214_v11 = vadd.f32 %v1040_v9, %v1038_v8  ;;  %v1052_v15 = vld [vmem:[%s166_s11 + $0x58] sm:$0xff]  ;;  %v217_v16 = vadd.f32 %v1048_v13, %v1046_v12  ;;  %v1058_v18 = vld [vmem:[%s166_s11 + $0x60] sm:$0xff]  ;;  %v1060_v19 = vld [vmem:[%s166_s11 + $0x68] sm:$0xff]  ;;  %v253_v43 = vadd.s32 4294967288, %v248_v41  ;;  %v260_v45 = vadd.s32 4294967280, %v248_v41  ;;  %s1132_s6 = scalar_lea.vmem [#allocation5], %s652_s9 }
  0x3d   : > { %v220_v17 = vadd.f32 %v1052_v15, %v1050_v14  ;;  %v1062_v20 = vld [vmem:[%s166_s11 + $0x70] sm:$0xff]  ;;  %v1064_v21 = vld [vmem:[%s166_s11 + $0x78] sm:$0xff]  ;;  %v223_v22 = vadd.f32 %v1060_v19, %v1058_v18  ;;  %v238_v25 = vld [vmem:[%s1214_s1] sm:$0xf]  ;;  %v267_v46 = vadd.s32 4294967272, %v248_v41  ;;  %v251_v48 = vsub.s32 %v248_v41, %v1112_v42  ;;  %s672_s9 = sshll.u32 %s929_s16, 11 }
  0x3e   : > { %v226_v23 = vadd.f32 %v1064_v21, %v1062_v20  ;;  %685 = vmatpush3.xpose.msk.msra.mxu0 %vm302_vm0, %v238_v25  ;;  %v379_v26 = vld [vmem:[%s1215_s2] sm:$0xff]  ;;  %v380_v27 = vld [vmem:[%s1215_s2 + $0x8] sm:$0xff]  ;;  %vm1082_vm3 = vmpackc.low %vm387_vm2, %vm387_vm2  ;;  %v256_v50 = vsub.s32 %v253_v43, %v1112_v42  ;;  %v274_v51 = vadd.s32 4294967264, %v248_v41  ;;  %v263_v52 = vsub.s32 %v260_v45, %v1112_v42  ;;  %s572_s7 = sshll.u32 %s1132_s6, 4  ;;  %s1163_s19 = scalar_lea.hbm %s1216_s3, %s672_s9  ;;  %s1165_s7 = int_to_ptr.vmem [resolvable:$true] %s572_s7 }
  0x3f   : > { %209 = vadd.xlane.f32.xlu0 %v208_v10  ;;  %v709_v29 = vpack.c.bf16 %v380_v27, %v379_v26  ;;  %v381_v31 = vld [vmem:[%s1215_s2 + $0x10] sm:$0xff]  ;;  %v382_v32 = vld [vmem:[%s1215_s2 + $0x18] sm:$0xff]  ;;  %v383_v34 = vld [vmem:[%s1215_s2 + $0x20] sm:$0xff]  ;;  %v270_v55 = vsub.s32 %v267_v46, %v1112_v42  ;;  %v281_v56 = vadd.s32 4294967256, %v248_v41  ;;  %v288_v63 = vadd.s32 4294967248, %v248_v41  ;;  %s559_s16 = scalar_lea.sflag [#allocation4], %s1012_s5 }
  0x40   : > { %215 = vadd.xlane.f32.xlu1 %v214_v11  ;;  %v713_v33 = vpack.c.bf16 %v382_v32, %v381_v31  ;;  %v384_v35 = vld [vmem:[%s1215_s2 + $0x28] sm:$0xff]  ;;  %v385_v37 = vld [vmem:[%s1215_s2 + $0x30] sm:$0xff]  ;;  %v386_v38 = vld [vmem:[%s1215_s2 + $0x38] sm:$0xff]  ;;  %v277_v62 = vsub.s32 %v274_v51, %v1112_v42  ;;  %vm293_vm9 = vcmask 458112   ;;  %vm300_vm10 = vcmask 523712   ;;  %s811_s20 = scalar_lea.vmem %s1165_s7, 2048 }
  0x41   : > { %711 = vmatpush3.bf16.xpose.msk.msra.mxu1 %vm1082_vm3, %v709_v29  ;;  %v717_v36 = vpack.c.bf16 %v384_v35, %v383_v34  ;;  %v721_v39 = vpack.c.bf16 %v386_v38, %v385_v37  ;;  %v284_v11 = vsub.s32 %v281_v56, %v1112_v42  ;;  %p812_p6 = scmp.ne.s32.totalorder %s1165_s7, %s811_s20  ;;  %p1225_p11 = scmp.ne.s32.totalorder %s1220_s24, 0 }
  0x42   : > { %712 = vmatprep.subr.bf16.mxu1 %v884_v28  ;;  %s885_s22 = smov [#allocation5]  }
  0x43   : > { %218 = vadd.xlane.f32.xlu0 %v217_v16  ;;  %v295_v16 = vadd.s32 4294967240, %v248_v41  ;;  %p813_p12 = pnand %p812_p6, %p1225_p11  ;;  %s815_s26 = sshll.u32 %s885_s22, 4  ;;  %s816_s26 = int_to_ptr.vmem [resolvable:$false] %s815_s26 }
  0x44   : > { %221 = vadd.xlane.f32.xlu1 %v220_v17  ;;  %s817_s27 = scalar_lea.vmem %s816_s26, 4096  ;;  %p818_p8 = scmp.lt.s32.totalorder %s1165_s7, %s816_s26 }
  0x45   : > { %v298_v31 = vsub.s32 %v295_v16, %v1112_v42  ;;  %p814_p13 = pneg %p813_p12  ;;  %p819_p10 = scmp.lt.s32.totalorder %s817_s27, %s811_s20 }
  0x47   : > { %224 = vadd.xlane.f32.xlu0 %v223_v22  ;;  %p820_p0 = por %p819_p10, %p818_p8 }
  0x48   : > { %227 = vadd.xlane.f32.xlu1 %v226_v23 }
  0x49   : > { %715 = vmatpush3.bf16.xpose.msk.msra.mxu1 %vm1082_vm3, %v713_v33  ;;  %p821_p2 = pnand %p820_p0, %p814_p13 }
  0x4a   : > { %716 = vmatprep.subr.bf16.mxu1 %v884_v28 }
  0x51   : > { %719 = vmatpush3.bf16.xpose.msk.msra.mxu1 %vm1082_vm3, %v717_v36 }
  0x52   : > { %720 = vmatprep.subr.bf16.mxu1 %v884_v28  ;;  %v291_v28 = vsub.s32 %v288_v63, %v1112_v42 }
  0x59   : > { %723 = vmatpush3.bf16.xpose.msk.msra.mxu1 %vm1082_vm3, %v721_v39 }
  0xc8   : > { %v207_v44 = vpop.xlane.xlu0 %206 }
  0xc9   : > { %v213_v47 = vpop.xlane.xlu1 %212  ;;  %v230_v49 = vmul.f32 0.00390625, %v207_v44 }
  0xca   : > { %v232_v53 = vmul.f32 0.00390625, %v213_v47 }
  0xcb   : > { %v252_v60 = vrot.slane %v230_v49, %v251_v48 }
  0xcc   : > { %v210_v54 = vpop.xlane.xlu0 %209  ;;  %v264_v3 = vrot.slane %v232_v53, %v263_v52 }
  0xcd   : > { %v231_v57 = vmul.f32 0.00390625, %v210_v54  ;;  %v216_v58 = vpop.xlane.xlu1 %215 }
  0xce   : > { %v233_v59 = vmul.f32 0.00390625, %v216_v58 }
  0xcf   : > { %v257_v61 = vrot.slane %v231_v57, %v256_v50  ;;  %v493_v50 = vsub.s32 0, %v1112_v42 }
  0xd0   : > { %v271_v7 = vrot.slane %v233_v59, %v270_v55  ;;  %v219_v10 = vpop.xlane.xlu0 %218 }
  0xd1   : > { %v259_v17 = vsel %vm258_vm4, %v257_v61, %v252_v60  ;;  %v234_v22 = vmul.f32 0.00390625, %v219_v10  ;;  %v222_v23 = vpop.xlane.xlu1 %221 }
  0xd2   : > { %v266_v24 = vsel %vm265_vm5, %v264_v3, %v259_v17  ;;  %v235_v25 = vmul.f32 0.00390625, %v222_v23 }
  0xd3   : > { %v273_v26 = vsel %vm272_vm6, %v271_v7, %v266_v24  ;;  %v278_v27 = vrot.slane %v234_v22, %v277_v62 }
  0xd4   : > { %v285_v29 = vrot.slane %v235_v25, %v284_v11  ;;  %v225_v30 = vpop.xlane.xlu0 %224 }
  0xd5   : > { %v280_v32 = vsel %vm279_vm7, %v278_v27, %v273_v26  ;;  %v236_v33 = vmul.f32 0.00390625, %v225_v30  ;;  %v228_v34 = vpop.xlane.xlu1 %227 }
  0xd6   : > { %v237_v35 = vmul.f32 0.00390625, %v228_v34  ;;  %v287_v37 = vsel %vm286_vm8, %v285_v29, %v280_v32 }
  0xd7   : > { %v292_v36 = vrot.slane %v236_v33, %v291_v28 }
  0xd8   : > { %v299_v38 = vrot.slane %v237_v35, %v298_v31 }
  0xd9   : > { %v294_v39 = vsel %vm293_vm9, %v292_v36, %v287_v37 }
  0xda   : > { %v301_v40 = vsel %vm300_vm10, %v299_v38, %v294_v39 }
  0xdb   : > { %687 = vmatmul.mubr.msk.f32.vlgmr.msra.gmra.mrb[0].mxu0 %vm302_vm0, %v301_v40 }
 0x1ae   : > { %v374_v41 = vpop.f32.mrb[0].mxu0 }
 0x1af   : > { %v378_v43 = vmax.f32 %v374_v41, 0.0  ;;  %v688_v44 = vpop.f32.mrb[1].mxu0 }
 0x1b1   : > { %706 = vmatmul.mubr.msk.f32.vlgmr.msra.gmra.mrb[0].mxu1 %vm387_vm2, %v378_v43 }
 0x284   : > { %v481_v45 = vpop.f32.mrb[0].mxu1 }
 0x285   : > { %v665_v46 = vmul.f32 -1.442695, %v481_v45  ;;  %v707_v47 = vpop.f32.mrb[1].mxu1 }
 0x287   : > { %777 = vpow2.f32 %v665_v46 }
 0x291   : > { %v778_v48 = vpop.eup %777 }
 0x292   : > { %v488_v49 = vadd.f32 1.0, %v778_v48 }
 0x294   : > { %779 = vrcp.f32 %v488_v49 }
 0x29e   : > { %v780_v51 = vpop.eup %779 }
 0x29f   : > { %v494_v52 = vrot.slane %v780_v51, %v493_v50 }
 0x2a1   : > { %500 = vbcast.lane.b32.xlu1 %v494_v52, 264  ;;  %496 = vbcast.lane.b32.xlu0 %v494_v52, 256 }
 0x2a5   : > { %504 = vbcast.lane.b32.xlu1 %v494_v52, 272  ;;  %512 = vbcast.lane.b32.xlu0 %v494_v52, 288 }
 0x2a9   : > { %508 = vbcast.lane.b32.xlu1 %v494_v52, 280  ;;  %520 = vbcast.lane.b32.xlu0 %v494_v52, 304 }
 0x2ad   : > { %516 = vbcast.lane.b32.xlu1 %v494_v52, 296 }
 0x2b1   : > { %524 = vbcast.lane.b32.xlu1 %v494_v52, 312 }
 0x313   : > { %v501_v53 = vpop.permute.xlu1 %500  ;;  %v497_v54 = vpop.permute.xlu0 %496 }
 0x314   : > { %v528_v55 = vmul.f32 %v501_v53, %v1032_v5  ;;  %v529_v56 = vmul.f32 %v501_v53, %v1034_v6  ;;  %v526_v57 = vmul.f32 %v497_v54, %v1022_v0  ;;  %v527_v42 = vmul.f32 %v497_v54, %v1024_v1 }
 0x316   : > { %544 = vst [vmem:[%s1132_s6 + $0x10] sm:$0xff] %v528_v55  ;;  %545 = vst [vmem:[%s1132_s6 + $0x18] sm:$0xff] %v529_v56 }
 0x317   : > { %542 = vst [vmem:[%s1132_s6] sm:$0xff] %v526_v57  ;;  %543 = vst [vmem:[%s1132_s6 + $0x8] sm:$0xff] %v527_v42  ;;  %v505_v5 = vpop.permute.xlu1 %504  ;;  %v513_v0 = vpop.permute.xlu0 %512 }
 0x318   : > { %v530_v1 = vmul.f32 %v505_v5, %v1026_v2  ;;  %v531_v6 = vmul.f32 %v505_v5, %v1030_v4  ;;  %v534_v58 = vmul.f32 %v513_v0, %v1046_v12  ;;  %v535_v59 = vmul.f32 %v513_v0, %v1048_v13 }
 0x31a   : > { %546 = vst [vmem:[%s1132_s6 + $0x20] sm:$0xff] %v530_v1  ;;  %547 = vst [vmem:[%s1132_s6 + $0x28] sm:$0xff] %v531_v6 }
 0x31b   : > { %550 = vst [vmem:[%s1132_s6 + $0x40] sm:$0xff] %v534_v58  ;;  %551 = vst [vmem:[%s1132_s6 + $0x48] sm:$0xff] %v535_v59  ;;  %v509_v60 = vpop.permute.xlu1 %508  ;;  %v521_v61 = vpop.permute.xlu0 %520 }
 0x31c   : > { %v532_v2 = vmul.f32 %v509_v60, %v1038_v8  ;;  %v533_v62 = vmul.f32 %v509_v60, %v1040_v9  ;;  %v538_v4 = vmul.f32 %v521_v61, %v1058_v18  ;;  %v539_v12 = vmul.f32 %v521_v61, %v1060_v19 }
 0x31e   : > { %548 = vst [vmem:[%s1132_s6 + $0x30] sm:$0xff] %v532_v2  ;;  %549 = vst [vmem:[%s1132_s6 + $0x38] sm:$0xff] %v533_v62 }
 0x31f   : > { %554 = vst [vmem:[%s1132_s6 + $0x60] sm:$0xff] %v538_v4  ;;  %555 = vst [vmem:[%s1132_s6 + $0x68] sm:$0xff] %v539_v12  ;;  %v517_v13 = vpop.permute.xlu1 %516 }
 0x320   : > { %v536_v63 = vmul.f32 %v517_v13, %v1050_v14  ;;  %v537_v3 = vmul.f32 %v517_v13, %v1052_v15 }
 0x322   : > { %552 = vst [vmem:[%s1132_s6 + $0x50] sm:$0xff] %v536_v63  ;;  %553 = vst [vmem:[%s1132_s6 + $0x58] sm:$0xff] %v537_v3 }
 0x323   : > { %v525_v8 = vpop.permute.xlu1 %524 }
 0x324   : > { %v540_v9 = vmul.f32 %v525_v8, %v1062_v20  ;;  %v541_v14 = vmul.f32 %v525_v8, %v1064_v21 }
 0x326   : > { %556 = vst [vmem:[%s1132_s6 + $0x70] sm:$0xff] %v540_v9  ;;  %557 = vst [vmem:[%s1132_s6 + $0x78] sm:$0xff] %v541_v14 }
 0x327   : > { %824 = shalt.err (!%p821_p2)
}
 0x328   : > { %s825_s28 = scalar_lea.hbm %s1163_s19, 2048  ;;  %s829_s10 = scalar_lea.hbm %s1216_s3, 4096 }
 0x329   : > { %p826_p4 = scmp.ne.s32.totalorder %s1163_s19, %s825_s28  ;;  %p830_p9 = scmp.lt.u32.totalorder %s1163_s19, %s1216_s3 }
 0x32a   : > { %p831_p1 = scmp.lt.u32.totalorder %s829_s10, %s825_s28  ;;  %p833_p6 = scmp.lt.u32.totalorder %s825_s28, %s1163_s19 }
 0x32b   : > { %p827_p5 = pnand %p826_p4, %p1225_p11 }
 0x32c   : > { %p832_p3 = por %p831_p1, %p830_p9 }
 0x32d   : > { %p828_p7 = pneg %p827_p5 }
 0x32e   : > { %p834_p12 = por %p833_p6, %p832_p3 }
 0x330   : > { %p835_p13 = pnand %p834_p12, %p828_p7 }
 0x332   : > { %838 = shalt.err (!%p835_p13)
}
 0x333   : > { %s886_s4 = smov 256   ;;  %s887_s6 = smov 16  }
 0x334   : > { %726 = dma.vmem_to_hbm [thread:$0]  (%p1225_p11), %s1165_s7, 2048, %s1163_s19, %s559_s16, %s886_s4, %s886_s4, %s887_s6  }
 0x335 PF: > { %s587_s9 = sand.u32 1, %s865_s12   ;;  %p1226_p8 = scmp.ne.s32.totalorder %s1221_s25, 0 }
 0x336   : > { %p1227_p10 = scmp.ge.s32.totalorder %s877_s15, 2  ;;  %s588_s8 = scalar_lea.sflag [#allocation4], %s587_s9 }
 0x338   : > { %p733_p0 = pnand %p1227_p10, %p1226_p8 }
 0x33a   : > { %860 = dma.done.wait (!%p733_p0), %s588_s8, 2048  }
 0x33b   : > { %862 = vsyncadd (!%p733_p0), %s588_s8, 4294965248  ;;  %p16_p2 = scmp.ge.s32.totalorder %s933_s18, 4   ;;  %s1228_s12 = smov %s869_s13 }
 0x33c   : > { %s1229_s13 = smov %s873_s14  ;;  %s1230_s14 = smov %s945_s21 }
 0x33d   : > { %s1231_s15 = smov %s933_s18  ;;  %18 = sbr.rel (!%p16_p2) target bundleno = 5 (0x5), region = 77 }
 0x344   :  { %593 = vsyncpa [#allocation3], 1 }
 0x345   :  { %595 = vsyncpa [#allocation3 + $0x1], 1 }
 0x346   :  { %596 = vsyncpa [#allocation4], 1 }
 0x347   :  { %598 = vsyncpa [#allocation4 + $0x1], 1 }

</bundles_post_ra>
